<compile_context>
chip_gen: v7x
topology: tpu7x:2x2x1
jax: 0.10.0
libtpu: 0.0.40
codegen_flags: <defaults>
</compile_context>

<pallas_src>
import functools

import jax
import jax.numpy as jnp
from jax.experimental import pallas as pl
from jax.experimental.pallas import tpu as pltpu


def _cdiv(a, b):
    return (a + b - 1) // b


def _round_up(x, m):
    return ((x + m - 1) // m) * m


def _choose_tiling(R, L, out_w=8, target_block_bytes=4 << 20):
    """Pick (row_tile, padded_rows, grid_len, vmem_limit_bytes).

    Memory-bound kernel -> target ~2-4 MiB double-buffered input blocks.
    VMEM model counts: 2x input (TR*L*4), ~1x input for the materialized exp
    intermediate, 2x output (TR*out_w*4) and 2x resident W (L*128*4).
    """
    try:
        vmem_cap = int(pltpu.get_tpu_info().vmem_capacity_bytes)
    except Exception:  # not on a TPU backend / older API — be conservative (v7x)
        vmem_cap = 64 << 20
    budget = min(vmem_cap // 2, 48 << 20)

    row_bytes = L * 4
    w_bytes = 2 * L * 128 * 4
    rows_fit = max(8, (budget - w_bytes) // (3 * row_bytes + 2 * out_w * 4))
    tr_target = max(8, min(target_block_bytes // row_bytes, rows_fit))
    tr_target = (tr_target // 8) * 8

    # Minimize zero-row padding waste; keep >= 2 grid steps so both v7x
    # TensorCores get work when there are enough rows.
    num_tiles = _cdiv(R, tr_target)
    if R >= 16:
        num_tiles = max(num_tiles, 2)
    tr = max(8, _round_up(_cdiv(R, num_tiles), 8))
    r_pad = _round_up(R, tr)
    grid_len = r_pad // tr

    vmem_need = 3 * tr * L * 4 + 2 * tr * out_w * 4 + w_bytes
    vmem_limit = int(min(vmem_cap * 3 // 4, max(32 << 20, 2 * vmem_need)))
    return tr, r_pad, grid_len, vmem_limit


def _spatial_softmax_kernel(feat_ref, w_ref, out_ref, *, inv_temperature):
    # feat_ref: (TR, L)   f32  — rows of the flattened feature map
    # w_ref   : (L, 128)  f32  — [pos_x | pos_y | ones | 0 ... 0]
    # out_ref : (TR, 8)   f32  — [ex | ey | 1 | 0 ... 0]  (already normalized)
    f = feat_ref[...]
    if inv_temperature != 1.0:                       # static Python constant
        f = f * jnp.float32(inv_temperature)
    m = jnp.max(f, axis=-1, keepdims=True)            # (TR, 1) row max (stability)
    e = jnp.exp(f - m)                                 # (TR, L) — EUP
    # One lane-dense MXU matmul folds the three cross-lane reductions:
    #   acc = [sum(pos_x*e), sum(pos_y*e), sum(e), 0, ...]
    acc = jnp.dot(e, w_ref[...], preferred_element_type=jnp.float32)  # (TR, 128)
    s = acc[:, 2:3]                                    # sum(e) > 0 always
    # Fused normalization; exact divide to hold the 1e-5 reference tolerance.
    out_ref[...] = acc[:, 0:8] / s


def _make_pos_buffers(height, width):
    # Exactly mirrors the PyTorch __init__ (np.meshgrid default indexing='xy'
    # with linspace(height) first, linspace(width) second, then a flat
    # reshape) — including its convention for non-square H/W.
    px, py = jnp.meshgrid(
        jnp.linspace(-1.0, 1.0, height),
        jnp.linspace(-1.0, 1.0, width),
    )
    pos_x = px.reshape(height * width).astype(jnp.float32)
    pos_y = py.reshape(height * width).astype(jnp.float32)
    return pos_x, pos_y


def make_spatial_softmax(height, width, channel, temperature=None, data_format='NCHW'):
    """Factory mirroring SpatialSoftmax.__init__; returns a jitted forward fn."""
    # PyTorch: `if temperature:` -> falsy (None/0) means 1.0.
    temp = float(temperature) if temperature else 1.0
    # TODO(synk): when temperature is a learned nn.Parameter it would have to be
    # passed as a runtime scalar; here it is folded as a static constant.
    pos_x, pos_y = _make_pos_buffers(height, width)
    L = height * width
    out_w = 8

    # W built ONCE (hoisted out of the per-call path): (L, 128), lane-dense
    # MXU operand = [pos_x | pos_y | ones | 0 ... 0].
    wmat = jnp.concatenate(
        [
            pos_x[:, None],
            pos_y[:, None],
            jnp.ones((L, 1), jnp.float32),
            jnp.zeros((L, 125), jnp.float32),
        ],
        axis=1,
    )

    def forward(feature):
        if data_format == 'NHWC':
            # (N, H, W, C) -> (N, C, H, W); the original PyTorch branch has a
            # typo ('tranpose') — this implements the intended behavior.
            feature = jnp.transpose(feature, (0, 3, 1, 2))
        N, C = feature.shape[0], feature.shape[1]
        R = N * C
        feat2d = feature.reshape(R, L).astype(jnp.float32)

        tr, r_pad, grid_len, vmem_limit = _choose_tiling(R, L, out_w=out_w)
        if r_pad != R:
            # Zero rows are harmless for the shifted softmax; sliced off below.
            feat2d = jnp.pad(feat2d, ((0, r_pad - R), (0, 0)))

        cost = pl.CostEstimate(
            flops=2 * r_pad * L * 128 + 5 * r_pad * L,
            transcendentals=r_pad * L,
            bytes_accessed=r_pad * L * 4 + L * 128 * 4 + r_pad * out_w * 4,
        )

        out = pl.pallas_call(
            functools.partial(
                _spatial_softmax_kernel, inv_temperature=1.0 / temp
            ),
            out_shape=jax.ShapeDtypeStruct((r_pad, out_w), jnp.float32),
            grid=(grid_len,),
            in_specs=[
                pl.BlockSpec((tr, L), lambda i: (i, 0)),    # feature rows, tiled
                pl.BlockSpec((L, 128), lambda i: (0, 0)),   # pos weights, resident
            ],
            # Narrow (TR, 8) output block: last dim equals full array dim -> legal;
            # cuts output HBM traffic 16x vs. the old (TR, 128) store.
            out_specs=pl.BlockSpec((tr, out_w), lambda i: (i, 0)),
            compiler_params=pltpu.CompilerParams(
                dimension_semantics=("parallel",),
                vmem_limit_bytes=vmem_limit,
            ),
            cost_estimate=cost,
        )(feat2d, wmat)

        keypoints = out[:R, 0:2]                 # [ex | ey] per (n, c) row
        return keypoints.reshape(-1, channel * 2)

    return jax.jit(forward)


def spatial_softmax_reference(feature_nchw, pos_x, pos_y, temperature=1.0):
    N, C, H, W = feature_nchw.shape
    f = feature_nchw.reshape(N * C, H * W).astype(jnp.float32) / temperature
    p = jax.nn.softmax(f, axis=-1)
    ex = jnp.sum(pos_x[None, :] * p, axis=1, keepdims=True)
    ey = jnp.sum(pos_y[None, :] * p, axis=1, keepdims=True)
    return jnp.concatenate([ex, ey], axis=1).reshape(N, C * 2)


if __name__ == "__main__":
    # Small shapes consistent with the module: batch=2, channels=4, H=W=16.
    N, C, H, W = 2, 4, 16, 16
    key = jax.random.PRNGKey(0)
    x = jax.random.normal(key, (N, C, H, W), dtype=jnp.float32)

    pos_x, pos_y = _make_pos_buffers(H, W)

    # Default temperature path (None -> 1.0), NCHW.
    forward = make_spatial_softmax(H, W, C, temperature=None, data_format='NCHW')
    out = jax.block_until_ready(forward(x))
    ref = spatial_softmax_reference(x, pos_x, pos_y, 1.0)
    assert out.shape == (N, C * 2), out.shape
    assert jnp.allclose(out, ref, atol=1e-5, rtol=1e-5), (
        f"max abs err = {jnp.max(jnp.abs(out - ref))}")

    # Second case exercising the multi-tile (grid >= 2) + row-padding path.
    N2, C2 = 3, 6
    x2 = jax.random.normal(jax.random.PRNGKey(1), (N2, C2, H, W), dtype=jnp.float32)
    forward2 = make_spatial_softmax(H, W, C2, temperature=None, data_format='NCHW')
    out2 = jax.block_until_ready(forward2(x2))
    ref2 = spatial_softmax_reference(x2, pos_x, pos_y, 1.0)
    assert out2.shape == (N2, C2 * 2), out2.shape
    assert jnp.allclose(out2, ref2, atol=1e-5, rtol=1e-5), (
        f"max abs err = {jnp.max(jnp.abs(out2 - ref2))}")

    print("KERNEL_OK")
</pallas_src>

<mosaic_0001>
module attributes {stable_mosaic.version = 11 : i64} {
  func.func @_spatial_softmax_kernel(%arg0: i32, %arg1: memref<8x256xf32, #tpu.memory_space<vmem>>, %arg2: memref<256x128xf32, #tpu.memory_space<vmem>>, %arg3: memref<8x8xf32, #tpu.memory_space<vmem>>) attributes {dimension_semantics = [#tpu.dimension_semantics<parallel>], iteration_bounds = array<i64: 1>, scalar_prefetch = 0 : i64, scratch_operands = 0 : i64, tpu.core_type = #tpu.core_type<tc>, window_params = [{transform_indices = @transform_0, window_bounds = array<i64: 8, 256>}, {pipeline_mode = #tpu.pipeline_mode<synchronous>, transform_indices = @transform_1, window_bounds = array<i64: 256, 128>}, {transform_indices = @transform_2, window_bounds = array<i64: 8, 8>}]} {
    %c0 = arith.constant 0 : index
    %c0_0 = arith.constant 0 : index
    %0 = vector.load %arg1[%c0, %c0_0] : memref<8x256xf32, #tpu.memory_space<vmem>>, vector<8x256xf32>
    %cst = arith.constant dense<0xFF800000> : vector<8xf32>
    %1 = vector.multi_reduction <maximumf>, %0, %cst [1] : vector<8x256xf32> to vector<8xf32>
    %2 = vector.shape_cast %1 : vector<8xf32> to vector<8x1xf32>
    %3 = vector.broadcast %2 : vector<8x1xf32> to vector<8x256xf32>
    %4 = arith.subf %0, %3 : vector<8x256xf32>
    %5 = math.exp %4 : vector<8x256xf32>
    %c0_1 = arith.constant 0 : index
    %c0_2 = arith.constant 0 : index
    %6 = vector.load %arg2[%c0_1, %c0_2] : memref<256x128xf32, #tpu.memory_space<vmem>>, vector<256x128xf32>
    %cst_3 = arith.constant dense<0.000000e+00> : vector<8x128xf32>
    %7 = tpu.matmul %5, %6, %cst_3 {dimension_numbers = #tpu.dot_dimension_numbers<[1], [0], [0], [1], [0, 0, 1, 1], [], []>} : vector<8x256xf32>, vector<256x128xf32>, vector<8x128xf32> -> vector<8x128xf32>
    %8 = vector.extract_strided_slice %7 {offsets = [0, 2], sizes = [8, 1], strides = [1, 1]} : vector<8x128xf32> to vector<8x1xf32>
    %9 = vector.extract_strided_slice %7 {offsets = [0, 0], sizes = [8, 8], strides = [1, 1]} : vector<8x128xf32> to vector<8x8xf32>
    %10 = vector.broadcast %8 : vector<8x1xf32> to vector<8x8xf32>
    %11 = arith.divf %9, %10 : vector<8x8xf32>
    %c0_4 = arith.constant 0 : index
    %c0_5 = arith.constant 0 : index
    %12 = vector.load %arg3[%c0_4, %c0_5] : memref<8x8xf32, #tpu.memory_space<vmem>>, vector<8x8xf32>
    tpu.vector_store %arg3[%c0_4, %c0_5], %11 {strides = array<i32>} : memref<8x8xf32, #tpu.memory_space<vmem>>, vector<8x8xf32>,
    return
  }
  func.func @transform_0(%arg0: i32) -> (i32, i32) {
    %c0_i32 = arith.constant 0 : i32
    %c0_i32_0 = arith.constant 0 : i32
    return %arg0, %c0_i32 : i32, i32
  }
  func.func @transform_1(%arg0: i32) -> (i32, i32) {
    %c0_i32 = arith.constant 0 : i32
    %c0_i32_0 = arith.constant 0 : i32
    %c0_i32_1 = arith.constant 0 : i32
    return %c0_i32, %c0_i32_0 : i32, i32
  }
  func.func @transform_2(%arg0: i32) -> (i32, i32) {
    %c0_i32 = arith.constant 0 : i32
    %c0_i32_0 = arith.constant 0 : i32
    return %arg0, %c0_i32 : i32, i32
  }
}

</mosaic_0001>

<bundles_post_ra>
// kernel: forward.1
= control target key start
LH: loop header
LB: loop body
LE: loop exit
PB: predicated region body
PF: predicated region fallthrough
CT: control target
= control target key end

     0   :  { %7 = vsyncpa [#allocation3], 0  ;;  %s254_s9 = smov [#allocation2]   ;;  %s302_s0 = inlined_call_operand.vmem [shape: f32[8,256], index: 0, kind: input, shape index: {}]   ;;  %s303_s1 = inlined_call_operand.hbm [shape: f32[256,128], index: 1, kind: input, shape index: {}]   ;;  %s304_s2 = inlined_call_operand.vmem [shape: f32[8,8], index: 2, kind: output, shape index: {}]  }
   0x1   :  { %s15_s10 = sshll.u32 %s254_s9, 4  ;;  %s230_s13 = scalar_lea.hbm %s303_s1, 4096  ;;  %s16_s10 = int_to_ptr.vmem [resolvable:$true] %s15_s10 }
   0x2   :  { %p231_p0 = scmp.ne.s32.totalorder %s303_s1, %s230_s13  ;;  %p234_p1 = scmp.lt.u32.totalorder %s230_s13, %s303_s1 }
   0x4   :  { %p236_p2 = pnand %p234_p1, %p231_p0 }
   0x6   :  { %239 = shalt.err (!%p236_p2)
}
   0x7   :  { %s240_s18 = scalar_lea.vmem %s16_s10, 4096  ;;  %p245_p4 = scmp.lt.s32.totalorder %s16_s10, %s16_s10 }
   0x8   :  { %p241_p3 = scmp.ne.s32.totalorder %s16_s10, %s240_s18  ;;  %p246_p5 = scmp.lt.s32.totalorder %s240_s18, %s240_s18 }
   0xa   :  { %p247_p6 = por %p246_p5, %p245_p4 }
   0xc   :  { %p248_p7 = pnand %p247_p6, %p241_p3 }
   0xe   :  { %251 = shalt.err (!%p248_p7)
}
   0xf   :  { %s255_s19 = smov 128   ;;  %s256_s20 = smov 8  }
  0x10   :  { %21 = dma.hbm_to_vmem [thread:$0]  %s303_s1, 4096, %s16_s10, [#allocation3], %s255_s19, %s255_s19, %s256_s20  }
  0x11   :  { %252 = dma.done.wait [#allocation3], 4096  }
  0x12   :  { %253 = vsyncadd [#allocation3], 4294963200  ;;  %v288_v0 = vld [vmem:[%s302_s0] sm:$0xff]  ;;  %v293_v1 = vld [vmem:[%s302_s0 + $0x8] sm:$0xff]  ;;  %v257_v58 = vmov 2   ;;  %vm145_vm0 = vcmask 64512  }
  0x13   :  { %v52_v2 = vld [vmem:[#allocation2 + $0x80] sm:$0xff]  ;;  %v27_v3 = vmax.f32 %v288_v0, %v293_v1  ;;  %v53_v4 = vld [vmem:[#allocation2 + $0x88] sm:$0xff]  ;;  %v54_v9 = vld [vmem:[#allocation2 + $0x90] sm:$0xff]  ;;  %223 = vset.pattern.permute.xlu0 %v257_v58 }
  0x14   :  { %v36_v5 = vld [vmem:[#allocation2] sm:$0xff]  ;;  %v37_v6 = vld [vmem:[#allocation2 + $0x8] sm:$0xff]  ;;  %v187_v7 = vpack.c.bf16 %v53_v4, %v52_v2  ;;  %v55_v10 = vld [vmem:[#allocation2 + $0x98] sm:$0xff] }
  0x15   :  { %v189_v8 = vpack.c.bf16 %v37_v6, %v36_v5  ;;  %v38_v11 = vld [vmem:[#allocation2 + $0x10] sm:$0xff]  ;;  %28 = vmax.xlane.f32.xlu0 %v27_v3  ;;  %v191_v12 = vpack.c.bf16 %v55_v10, %v54_v9  ;;  %v39_v13 = vld [vmem:[#allocation2 + $0x18] sm:$0xff]  ;;  %v56_v14 = vld [vmem:[#allocation2 + $0xa0] sm:$0xff] }
  0x16   :  { %v57_v15 = vld [vmem:[#allocation2 + $0xa8] sm:$0xff]  ;;  %188 = vmatprep.subr.bf16.mxu0 %v187_v7  ;;  %v193_v16 = vpack.c.bf16 %v39_v13, %v38_v11  ;;  %v40_v18 = vld [vmem:[#allocation2 + $0x20] sm:$0xff]  ;;  %v58_v20 = vld [vmem:[#allocation2 + $0xb0] sm:$0xff] }
  0x17   :  { %190 = vmatpush3.bf16.msra.mxu0 %v189_v8  ;;  %v195_v17 = vpack.c.bf16 %v57_v15, %v56_v14  ;;  %v41_v19 = vld [vmem:[#allocation2 + $0x28] sm:$0xff]  ;;  %v59_v21 = vld [vmem:[#allocation2 + $0xb8] sm:$0xff]  ;;  %v42_v24 = vld [vmem:[#allocation2 + $0x30] sm:$0xff] }
  0x18   :  { %192 = vmatprep.subr.bf16.mxu0 %v191_v12  ;;  %v197_v22 = vpack.c.bf16 %v41_v19, %v40_v18  ;;  %v199_v23 = vpack.c.bf16 %v59_v21, %v58_v20  ;;  %v43_v25 = vld [vmem:[#allocation2 + $0x38] sm:$0xff]  ;;  %v60_v27 = vld [vmem:[#allocation2 + $0xc0] sm:$0xff]  ;;  %v61_v28 = vld [vmem:[#allocation2 + $0xc8] sm:$0xff] }
  0x19   :  { %v201_v26 = vpack.c.bf16 %v43_v25, %v42_v24  ;;  %v203_v29 = vpack.c.bf16 %v61_v28, %v60_v27  ;;  %v44_v30 = vld [vmem:[#allocation2 + $0x40] sm:$0xff]  ;;  %v45_v31 = vld [vmem:[#allocation2 + $0x48] sm:$0xff]  ;;  %v62_v33 = vld [vmem:[#allocation2 + $0xd0] sm:$0xff] }
  0x1a   :  { %v205_v32 = vpack.c.bf16 %v45_v31, %v44_v30  ;;  %v63_v34 = vld [vmem:[#allocation2 + $0xd8] sm:$0xff]  ;;  %v46_v36 = vld [vmem:[#allocation2 + $0x50] sm:$0xff]  ;;  %v64_v39 = vld [vmem:[#allocation2 + $0xe0] sm:$0xff] }
  0x1b   :  { %194 = vmatpush3.bf16.msra.mxu0 %v193_v16  ;;  %v207_v35 = vpack.c.bf16 %v63_v34, %v62_v33  ;;  %v47_v37 = vld [vmem:[#allocation2 + $0x58] sm:$0xff]  ;;  %v65_v40 = vld [vmem:[#allocation2 + $0xe8] sm:$0xff]  ;;  %v48_v42 = vld [vmem:[#allocation2 + $0x60] sm:$0xff] }
  0x1c   :  { %196 = vmatprep.subr.bf16.mxu0 %v195_v17  ;;  %v209_v38 = vpack.c.bf16 %v47_v37, %v46_v36  ;;  %v211_v41 = vpack.c.bf16 %v65_v40, %v64_v39  ;;  %v49_v43 = vld [vmem:[#allocation2 + $0x68] sm:$0xff]  ;;  %v66_v44 = vld [vmem:[#allocation2 + $0xf0] sm:$0xff]  ;;  %v67_v45 = vld [vmem:[#allocation2 + $0xf8] sm:$0xff] }
  0x1d   :  { %v213_v46 = vpack.c.bf16 %v49_v43, %v48_v42  ;;  %v215_v47 = vpack.c.bf16 %v67_v45, %v66_v44  ;;  %v50_v48 = vld [vmem:[#allocation2 + $0x70] sm:$0xff]  ;;  %v51_v49 = vld [vmem:[#allocation2 + $0x78] sm:$0xff] }
  0x1e   :  { %v217_v50 = vpack.c.bf16 %v51_v49, %v50_v48 }
  0x1f   :  { %198 = vmatpush3.bf16.msra.mxu0 %v197_v22 }
  0x20   :  { %200 = vmatprep.subr.bf16.mxu0 %v199_v23 }
  0x23   :  { %202 = vmatpush3.bf16.msra.mxu0 %v201_v26 }
  0x24   :  { %204 = vmatprep.subr.bf16.mxu0 %v203_v29 }
  0x27   :  { %206 = vmatpush3.bf16.msra.mxu0 %v205_v32 }
  0x28   :  { %208 = vmatprep.subr.bf16.mxu0 %v207_v35 }
  0x2b   :  { %210 = vmatpush3.bf16.msra.mxu0 %v209_v38 }
  0x2c   :  { %212 = vmatprep.subr.bf16.mxu0 %v211_v41 }
  0x2f   :  { %214 = vmatpush3.bf16.msra.mxu0 %v213_v46 }
  0x30   :  { %216 = vmatprep.subr.bf16.mxu0 %v215_v47 }
  0x33   :  { %218 = vmatpush3.bf16.msra.mxu0 %v217_v50 }
  0xa2   :  { %v29_v51 = vpop.xlane.xlu0 %28 }
  0xa3   :  { %v30_v52 = vsub.f32 %v288_v0, %v29_v51  ;;  %v31_v53 = vsub.f32 %v293_v1, %v29_v51 }
  0xa5   :  { %v32_v54 = vmul.f32 1.442695, %v30_v52  ;;  %v34_v55 = vmul.f32 1.442695, %v31_v53 }
  0xa7   :  { %224 = vpow2.f32 %v32_v54 }
  0xa8   :  { %226 = vpow2.f32 %v34_v55 }
  0xb1   :  { %v225_v56 = vpop.eup %224 }
  0xb2   :  { %v227_v57 = vpop.eup %226 }
  0xb3   :  { %132 = vmatprep.mubr.f32.mxu0 %v227_v57 }
  0xb4   :  { %133 = vmatmul.mubr.f32.vlgmr.msra.gmra.mrb[0].mxu0 %v225_v56 }
 0x187   :  { %v184_v59 = vpop.f32.mrb[0].mxu0 }
 0x188   :  { %v185_v60 = vpop.f32.mrb[1].mxu0 }
 0x189   :  { %v186_v61 = vadd.f32 %v185_v60, %v184_v59 }
 0x18b   :  { %140 = vperm.xlu0 %223, %v186_v61  }
 0x20a   :  { %v141_v62 = vpop.permute.xlu0 %140 }
 0x20b   :  { %228 = vrcp.f32 %v141_v62 }
 0x215   :  { %v229_v63 = vpop.eup %228 }
 0x216   :  { %v144_v0 = vmul.f32 %v229_v63, %v186_v61 }
 0x218   :  { %146 = vst.msk [vmem:[%s304_s2] sm:$0xff] %vm145_vm0, %v144_v0 }
 0x219   :  { %151 = vsyncpa [#allocation3], 1 }

</bundles_post_ra>
